<compile_context>
chip_gen: v5e
topology: v5e:2x2
jax: 0.10.0
libtpu: 0.0.40
codegen_flags: <defaults>
</compile_context>

<pallas_src>
import jax
import jax.numpy as jnp
from jax.experimental import pallas as pl
from jax.experimental.pallas import tpu as pltpu
import numpy as np

HIDDEN = 32          # hidden_dim
VOCAB = 64           # output_dim
MAX_LENGTH = 8       # max_length


def fused_decoder_kernel(tok_ref, h0_ref, enc_ref, emb_ref,
                         attn_w_ref, comb_w_ref, gru_w_ref,
                         bias_ref, out_w_ref,
                         out_ref, h_vmem):
    t = pl.program_id(0)
    B, H = h_vmem.shape
    V = VOCAB
    L = MAX_LENGTH

    # Initialize the carried hidden state once; it lives in VMEM scratch for
    # the whole decode (no HBM round-trip between steps).
    @pl.when(t == 0)
    def _():
        h_vmem[...] = h0_ref[...]

    h = h_vmem[...]                                               # (B, H)

    # ---- embedding lookup fused into the kernel: one-hot @ table (MXU) ----
    tok = tok_ref[...]                                            # (B, 1) int32
    onehot = (tok == jax.lax.broadcasted_iota(jnp.int32, (B, V), 1)
              ).astype(jnp.float32)                               # (B, V)
    emb = jnp.dot(onehot, emb_ref[...],
                  preferred_element_type=jnp.float32)             # (B, H)
    # TODO(synk): dropout(p=0.1) treated as eval-mode identity (no PRNG mask).

    # ---- attention weights: softmax(attn([emb, h])) without lane concat ----
    attn_b = bias_ref[0:1, 0:L]                                   # (1, L)
    logits = (jnp.dot(emb, attn_w_ref[0:H, :],
                      preferred_element_type=jnp.float32)
              + jnp.dot(h, attn_w_ref[H:2 * H, :],
                        preferred_element_type=jnp.float32)
              + attn_b)                                           # (B, L)
    logits = logits - jnp.max(logits, axis=1, keepdims=True)
    e = jnp.exp(logits)
    aw = e / jnp.sum(e, axis=1, keepdims=True)                    # (B, L)

    # ---- attn_applied = attn_weights @ encoder_outputs (shared enc) ----
    attn_applied = jnp.dot(aw, enc_ref[...],
                           preferred_element_type=jnp.float32)    # (B, H)

    # ---- attn_combine + relu (split matmuls, no concat) ----
    comb_b = bias_ref[1:2, 0:H]
    gru_in = (jnp.dot(emb, comb_w_ref[0:H, :],
                      preferred_element_type=jnp.float32)
              + jnp.dot(attn_applied, comb_w_ref[H:2 * H, :],
                        preferred_element_type=jnp.float32)
              + comb_b)
    gru_in = jnp.maximum(gru_in, 0.0)                             # (B, H)

    # ---- single-step GRU, gates from stacked (6,H,H) weights (no lane slice) ----
    def gate(x, w_idx, bias_row):
        return (jnp.dot(x, gru_w_ref[w_idx],
                        preferred_element_type=jnp.float32)
                + bias_ref[bias_row:bias_row + 1, 0:H])

    i_r = gate(gru_in, 0, 2)
    i_z = gate(gru_in, 1, 3)
    i_n = gate(gru_in, 2, 4)
    h_r = gate(h, 3, 5)
    h_z = gate(h, 4, 6)
    h_n = gate(h, 5, 7)

    r = jax.nn.sigmoid(i_r + h_r)
    z = jax.nn.sigmoid(i_z + h_z)
    n = jnp.tanh(i_n + r * h_n)
    h_new = (1.0 - z) * n + z * h                                 # (B, H)
    h_vmem[...] = h_new                                           # carry to step t+1

    # ---- output projection + log_softmax ----
    out_b = bias_ref[8:9, 0:V]
    out_logits = jnp.dot(h_new, out_w_ref[...],
                         preferred_element_type=jnp.float32) + out_b
    m = jnp.max(out_logits, axis=1, keepdims=True)
    shifted = out_logits - m
    lse = jnp.log(jnp.sum(jnp.exp(shifted), axis=1, keepdims=True))
    logp = shifted - lse                                          # (B, V)

    # ---- packed lane-dense output slab: one (B,128) writeback DMA per step ----
    out_ref[:, 0:V] = logp
    out_ref[:, V:V + H] = h_new
    out_ref[:, V + H:V + H + L] = aw
    out_ref[:, V + H + L:] = jnp.zeros((B, 128 - (V + H + L)), jnp.float32)


def pack_params(params):
    """Repack PyTorch-style params into kernel-friendly slabs (done once)."""
    H, V, L = HIDDEN, VOCAB, MAX_LENGTH
    w_ih, w_hh = params["w_ih"], params["w_hh"]        # (H, 3H), gate order r,z,n
    gru_w = jnp.stack([w_ih[:, 0:H], w_ih[:, H:2 * H], w_ih[:, 2 * H:3 * H],
                       w_hh[:, 0:H], w_hh[:, H:2 * H], w_hh[:, 2 * H:3 * H]],
                      axis=0)                           # (6, H, H)
    bias = jnp.zeros((16, 128), jnp.float32)
    bias = bias.at[0, 0:L].set(params["attn_b"][0])
    bias = bias.at[1, 0:H].set(params["comb_b"][0])
    bias = bias.at[2, 0:H].set(params["b_ih"][0, 0:H])
    bias = bias.at[3, 0:H].set(params["b_ih"][0, H:2 * H])
    bias = bias.at[4, 0:H].set(params["b_ih"][0, 2 * H:3 * H])
    bias = bias.at[5, 0:H].set(params["b_hh"][0, 0:H])
    bias = bias.at[6, 0:H].set(params["b_hh"][0, H:2 * H])
    bias = bias.at[7, 0:H].set(params["b_hh"][0, 2 * H:3 * H])
    bias = bias.at[8, 0:V].set(params["out_b"][0])
    return {
        "embedding": params["embedding"],   # (V, H)
        "attn_w": params["attn_w"],         # (2H, L)
        "comb_w": params["comb_w"],         # (2H, H)
        "gru_w": gru_w,                     # (6, H, H)
        "bias": bias,                       # (16, 128)
        "out_w": params["out_w"],           # (H, V)
    }


def attn_decoder_decode(packed, tokens, hidden_0, encoder_outputs):
    """Fused T-step, B-way batched decode (one pallas_call).

    tokens: (T, B) int32 (teacher-forced / beam tokens per step)
    hidden_0: (B, H); encoder_outputs: (L, H) shared across the batch.
    Returns (logp (T,B,V), hidden (T,B,H), attn_weights (T,B,L)).
    """
    T, B = tokens.shape
    H, V, L = HIDDEN, VOCAB, MAX_LENGTH
    tok3 = tokens.reshape(T, B, 1).astype(jnp.int32)

    grid_spec = pltpu.PrefetchScalarGridSpec(
        num_scalar_prefetch=0,
        grid=(T,),
        in_specs=[
            pl.BlockSpec((None, B, 1), lambda t: (t, 0, 0)),   # tokens (per-step tile)
            pl.BlockSpec((B, H), lambda t: (0, 0)),            # initial hidden
            pl.BlockSpec((L, H), lambda t: (0, 0)),            # encoder_outputs
            pl.BlockSpec((V, H), lambda t: (0, 0)),            # embedding table
            pl.BlockSpec((2 * H, L), lambda t: (0, 0)),        # attn weight
            pl.BlockSpec((2 * H, H), lambda t: (0, 0)),        # attn_combine weight
            pl.BlockSpec((6, H, H), lambda t: (0, 0, 0)),      # GRU gate weights
            pl.BlockSpec((16, 128), lambda t: (0, 0)),         # packed bias slab
            pl.BlockSpec((H, V), lambda t: (0, 0)),            # out weight
        ],
        out_specs=pl.BlockSpec((None, B, 128), lambda t: (t, 0, 0)),
        scratch_shapes=[pltpu.VMEM((B, H), jnp.float32)],       # carried hidden state
    )
    packed_out = pl.pallas_call(
        fused_decoder_kernel,
        grid_spec=grid_spec,
        out_shape=jax.ShapeDtypeStruct((T, B, 128), jnp.float32),
        compiler_params=pltpu.CompilerParams(
            dimension_semantics=("arbitrary",)),               # sequential recurrence
    )(tok3, hidden_0, encoder_outputs,
      packed["embedding"], packed["attn_w"], packed["comb_w"],
      packed["gru_w"], packed["bias"], packed["out_w"])

    logp = packed_out[:, :, 0:V]
    h_all = packed_out[:, :, V:V + H]
    aw = packed_out[:, :, V + H:V + H + L]
    return logp, h_all, aw


def attn_decoder_forward(packed, token, hidden_0, encoder_outputs):
    """Single-step, batch-1 path with the original module's interface."""
    tokens = jnp.reshape(token, (1, 1)).astype(jnp.int32)
    h0 = hidden_0.reshape(1, HIDDEN)
    logp, h_all, aw = attn_decoder_decode(packed, tokens, h0, encoder_outputs)
    return logp[0], h_all[0].reshape(1, 1, HIDDEN), aw[0]


def reference_decode(params, tokens, h0, encoder_outputs):
    """Pure-JAX reference: the PyTorch module applied per row, T times."""
    T, _ = tokens.shape
    H = HIDDEN
    h = h0
    logps, hs, aws = [], [], []
    for t in range(T):
        emb = params["embedding"][tokens[t]]                       # (B, H)
        attn_in = jnp.concatenate([emb, h], axis=1)
        aw = jax.nn.softmax(attn_in @ params["attn_w"] + params["attn_b"], axis=1)
        applied = aw @ encoder_outputs
        gru_in = jnp.maximum(
            jnp.concatenate([emb, applied], axis=1) @ params["comb_w"]
            + params["comb_b"], 0.0)
        gi = gru_in @ params["w_ih"] + params["b_ih"]
        gh = h @ params["w_hh"] + params["b_hh"]
        r = jax.nn.sigmoid(gi[:, :H] + gh[:, :H])
        z = jax.nn.sigmoid(gi[:, H:2 * H] + gh[:, H:2 * H])
        n = jnp.tanh(gi[:, 2 * H:] + r * gh[:, 2 * H:])
        h = (1.0 - z) * n + z * h
        logp = jax.nn.log_softmax(h @ params["out_w"] + params["out_b"], axis=1)
        logps.append(logp)
        hs.append(h)
        aws.append(aw)
    return jnp.stack(logps), jnp.stack(hs), jnp.stack(aws)


def init_params(key):
    ks = jax.random.split(key, 12)
    s = 0.1
    return {
        # nn.Embedding(output_dim, hidden_dim)
        "embedding": s * jax.random.normal(ks[0], (VOCAB, HIDDEN), jnp.float32),
        # nn.Linear(2H, max_length)  (stored transposed: (in, out))
        "attn_w": s * jax.random.normal(ks[1], (2 * HIDDEN, MAX_LENGTH), jnp.float32),
        "attn_b": s * jax.random.normal(ks[2], (1, MAX_LENGTH), jnp.float32),
        # nn.Linear(2H, H)
        "comb_w": s * jax.random.normal(ks[3], (2 * HIDDEN, HIDDEN), jnp.float32),
        "comb_b": s * jax.random.normal(ks[4], (1, HIDDEN), jnp.float32),
        # nn.GRU(H, H): weight_ih (3H, H) / weight_hh (3H, H), stored transposed
        "w_ih": s * jax.random.normal(ks[5], (HIDDEN, 3 * HIDDEN), jnp.float32),
        "b_ih": s * jax.random.normal(ks[6], (1, 3 * HIDDEN), jnp.float32),
        "w_hh": s * jax.random.normal(ks[7], (HIDDEN, 3 * HIDDEN), jnp.float32),
        "b_hh": s * jax.random.normal(ks[8], (1, 3 * HIDDEN), jnp.float32),
        # nn.Linear(H, output_dim)
        "out_w": s * jax.random.normal(ks[9], (HIDDEN, VOCAB), jnp.float32),
        "out_b": s * jax.random.normal(ks[10], (1, VOCAB), jnp.float32),
    }


if __name__ == "__main__":
    key = jax.random.PRNGKey(0)
    pkey, hkey, ekey, tkey = jax.random.split(key, 4)
    params = init_params(pkey)
    packed = pack_params(params)

    # ---- fused multi-step batched decode ----
    T, B = 6, 8
    tokens = jax.random.randint(tkey, (T, B), 0, VOCAB, dtype=jnp.int32)
    hidden_0 = 0.1 * jax.random.normal(hkey, (B, HIDDEN), jnp.float32)
    encoder_outputs = jax.random.normal(ekey, (MAX_LENGTH, HIDDEN), jnp.float32)

    logp, h_all, aw = attn_decoder_decode(packed, tokens, hidden_0, encoder_outputs)
    jax.block_until_ready((logp, h_all, aw))

    r_logp, r_h, r_aw = reference_decode(params, tokens, hidden_0, encoder_outputs)
    np.testing.assert_allclose(np.asarray(logp), np.asarray(r_logp), rtol=1e-3, atol=1e-3)
    np.testing.assert_allclose(np.asarray(h_all), np.asarray(r_h), rtol=1e-3, atol=1e-3)
    np.testing.assert_allclose(np.asarray(aw), np.asarray(r_aw), rtol=1e-3, atol=1e-3)
    assert logp.shape == (T, B, VOCAB)
    assert h_all.shape == (T, B, HIDDEN)
    assert aw.shape == (T, B, MAX_LENGTH)

    # ---- single-step, batch-1 path (original PyTorch module interface) ----
    token = jnp.array(5, dtype=jnp.int32)
    h0_11 = 0.1 * jax.random.normal(jax.random.PRNGKey(7), (1, 1, HIDDEN), jnp.float32)
    s_logp, s_h, s_aw = attn_decoder_forward(packed, token, h0_11, encoder_outputs)
    jax.block_until_ready((s_logp, s_h, s_aw))
    rs_logp, rs_h, rs_aw = reference_decode(
        params, token.reshape(1, 1), h0_11.reshape(1, HIDDEN), encoder_outputs)
    np.testing.assert_allclose(np.asarray(s_logp), np.asarray(rs_logp[0]), rtol=1e-3, atol=1e-3)
    np.testing.assert_allclose(np.asarray(s_h.reshape(1, HIDDEN)), np.asarray(rs_h[0]),
                               rtol=1e-3, atol=1e-3)
    np.testing.assert_allclose(np.asarray(s_aw), np.asarray(rs_aw[0]), rtol=1e-3, atol=1e-3)
    assert s_logp.shape == (1, VOCAB)
    assert s_h.shape == (1, 1, HIDDEN)
    assert s_aw.shape == (1, MAX_LENGTH)

    print("KERNEL_OK")
</pallas_src>

<mosaic_0001>
module attributes {stable_mosaic.version = 11 : i64} {
  func.func @fused_decoder_kernel(%arg0: i32, %arg1: memref<1x8x1xi32, #tpu.memory_space<vmem>>, %arg2: memref<8x32xf32, #tpu.memory_space<vmem>>, %arg3: memref<8x32xf32, #tpu.memory_space<vmem>>, %arg4: memref<64x32xf32, #tpu.memory_space<vmem>>, %arg5: memref<64x8xf32, #tpu.memory_space<vmem>>, %arg6: memref<64x32xf32, #tpu.memory_space<vmem>>, %arg7: memref<6x32x32xf32, #tpu.memory_space<vmem>>, %arg8: memref<16x128xf32, #tpu.memory_space<vmem>>, %arg9: memref<32x64xf32, #tpu.memory_space<vmem>>, %arg10: memref<1x8x128xf32, #tpu.memory_space<vmem>>, %arg11: memref<8x32xf32, #tpu.memory_space<vmem>>) attributes {dimension_semantics = [#tpu.dimension_semantics<arbitrary>], iteration_bounds = array<i64: 6>, scalar_prefetch = 0 : i64, scratch_operands = 1 : i64, tpu.core_type = #tpu.core_type<tc>, window_params = [{transform_indices = @transform_0, window_bounds = array<i64: 1, 8, 1>}, {pipeline_mode = #tpu.pipeline_mode<synchronous>, transform_indices = @transform_1, window_bounds = array<i64: 8, 32>}, {pipeline_mode = #tpu.pipeline_mode<synchronous>, transform_indices = @transform_2, window_bounds = array<i64: 8, 32>}, {pipeline_mode = #tpu.pipeline_mode<synchronous>, transform_indices = @transform_3, window_bounds = array<i64: 64, 32>}, {pipeline_mode = #tpu.pipeline_mode<synchronous>, transform_indices = @transform_4, window_bounds = array<i64: 64, 8>}, {pipeline_mode = #tpu.pipeline_mode<synchronous>, transform_indices = @transform_5, window_bounds = array<i64: 64, 32>}, {pipeline_mode = #tpu.pipeline_mode<synchronous>, transform_indices = @transform_6, window_bounds = array<i64: 6, 32, 32>}, {pipeline_mode = #tpu.pipeline_mode<synchronous>, transform_indices = @transform_7, window_bounds = array<i64: 16, 128>}, {pipeline_mode = #tpu.pipeline_mode<synchronous>, transform_indices = @transform_8, window_bounds = array<i64: 32, 64>}, {transform_indices = @transform_9, window_bounds = array<i64: 1, 8, 128>}]} {
    %c0_i32 = arith.constant 0 : i32
    %0 = arith.cmpi eq, %arg0, %c0_i32 : i32
    %1 = arith.extui %0 : i1 to i32
    %c0_i32_0 = arith.constant 0 : i32
    %2 = arith.cmpi ne, %1, %c0_i32_0 : i32
    scf.if %2 {
      %c0_78 = arith.constant 0 : index
      %c0_79 = arith.constant 0 : index
      %127 = vector.load %arg2[%c0_78, %c0_79] : memref<8x32xf32, #tpu.memory_space<vmem>>, vector<8x32xf32>
      %c0_80 = arith.constant 0 : index
      %c0_81 = arith.constant 0 : index
      %128 = vector.load %arg11[%c0_80, %c0_81] : memref<8x32xf32, #tpu.memory_space<vmem>>, vector<8x32xf32>
      tpu.vector_store %arg11[%c0_80, %c0_81], %127 {strides = array<i32>} : memref<8x32xf32, #tpu.memory_space<vmem>>, vector<8x32xf32>,
    } else {
    }
    %c0 = arith.constant 0 : index
    %c0_1 = arith.constant 0 : index
    %3 = vector.load %arg11[%c0, %c0_1] : memref<8x32xf32, #tpu.memory_space<vmem>>, vector<8x32xf32>
    %c0_2 = arith.constant 0 : index
    %c0_3 = arith.constant 0 : index
    %c0_4 = arith.constant 0 : index
    %4 = vector.load %arg1[%c0_2, %c0_3, %c0_4] : memref<1x8x1xi32, #tpu.memory_space<vmem>>, vector<1x8x1xi32>
    %5 = vector.shape_cast %4 : vector<1x8x1xi32> to vector<8x1xi32>
    %6 = tpu.iota {dimensions = array<i32: 1>} : vector<8x64xi32>
    %7 = vector.broadcast %5 : vector<8x1xi32> to vector<8x64xi32>
    %8 = arith.cmpi eq, %7, %6 : vector<8x64xi32>
    %9 = arith.extui %8 : vector<8x64xi1> to vector<8x64xi32>
    %10 = arith.sitofp %9 : vector<8x64xi32> to vector<8x64xf32>
    %c0_5 = arith.constant 0 : index
    %c0_6 = arith.constant 0 : index
    %11 = vector.load %arg4[%c0_5, %c0_6] : memref<64x32xf32, #tpu.memory_space<vmem>>, vector<64x32xf32>
    %cst = arith.constant dense<0.000000e+00> : vector<8x32xf32>
    %12 = tpu.matmul %10, %11, %cst {dimension_numbers = #tpu.dot_dimension_numbers<[1], [0], [0], [1], [0, 0, 1, 1], [], []>} : vector<8x64xf32>, vector<64x32xf32>, vector<8x32xf32> -> vector<8x32xf32>
    %c0_7 = arith.constant 0 : index
    %c0_8 = arith.constant 0 : index
    %13 = vector.load %arg8[%c0_7, %c0_8] : memref<16x128xf32, #tpu.memory_space<vmem>>, vector<1x8xf32>
    %c0_9 = arith.constant 0 : index
    %c0_10 = arith.constant 0 : index
    %14 = vector.load %arg5[%c0_9, %c0_10] : memref<64x8xf32, #tpu.memory_space<vmem>>, vector<32x8xf32>
    %cst_11 = arith.constant dense<0.000000e+00> : vector<8x8xf32>
    %15 = tpu.matmul %12, %14, %cst_11 {dimension_numbers = #tpu.dot_dimension_numbers<[1], [0], [0], [1], [0, 0, 1, 1], [], []>} : vector<8x32xf32>, vector<32x8xf32>, vector<8x8xf32> -> vector<8x8xf32>
    %c32 = arith.constant 32 : index
    %c0_12 = arith.constant 0 : index
    %16 = vector.load %arg5[%c32, %c0_12] : memref<64x8xf32, #tpu.memory_space<vmem>>, vector<32x8xf32>
    %cst_13 = arith.constant dense<0.000000e+00> : vector<8x8xf32>
    %17 = tpu.matmul %3, %16, %cst_13 {dimension_numbers = #tpu.dot_dimension_numbers<[1], [0], [0], [1], [0, 0, 1, 1], [], []>} : vector<8x32xf32>, vector<32x8xf32>, vector<8x8xf32> -> vector<8x8xf32>
    %18 = arith.addf %15, %17 : vector<8x8xf32>
    %19 = vector.broadcast %13 : vector<1x8xf32> to vector<8x8xf32>
    %20 = arith.addf %18, %19 : vector<8x8xf32>
    %cst_14 = arith.constant dense<0xFF800000> : vector<8xf32>
    %21 = vector.multi_reduction <maximumf>, %20, %cst_14 [1] : vector<8x8xf32> to vector<8xf32>
    %22 = vector.shape_cast %21 : vector<8xf32> to vector<8x1xf32>
    %23 = vector.broadcast %22 : vector<8x1xf32> to vector<8x8xf32>
    %24 = arith.subf %20, %23 : vector<8x8xf32>
    %25 = math.exp %24 : vector<8x8xf32>
    %cst_15 = arith.constant dense<0.000000e+00> : vector<8xf32>
    %26 = vector.multi_reduction <add>, %25, %cst_15 [1] : vector<8x8xf32> to vector<8xf32>
    %27 = vector.shape_cast %26 : vector<8xf32> to vector<8x1xf32>
    %28 = vector.broadcast %27 : vector<8x1xf32> to vector<8x8xf32>
    %29 = arith.divf %25, %28 : vector<8x8xf32>
    %c0_16 = arith.constant 0 : index
    %c0_17 = arith.constant 0 : index
    %30 = vector.load %arg3[%c0_16, %c0_17] : memref<8x32xf32, #tpu.memory_space<vmem>>, vector<8x32xf32>
    %cst_18 = arith.constant dense<0.000000e+00> : vector<8x32xf32>
    %31 = tpu.matmul %29, %30, %cst_18 {dimension_numbers = #tpu.dot_dimension_numbers<[1], [0], [0], [1], [0, 0, 1, 1], [], []>} : vector<8x8xf32>, vector<8x32xf32>, vector<8x32xf32> -> vector<8x32xf32>
    %c1 = arith.constant 1 : index
    %c0_19 = arith.constant 0 : index
    %32 = vector.load %arg8[%c1, %c0_19] : memref<16x128xf32, #tpu.memory_space<vmem>>, vector<1x32xf32>
    %c0_20 = arith.constant 0 : index
    %c0_21 = arith.constant 0 : index
    %33 = vector.load %arg6[%c0_20, %c0_21] : memref<64x32xf32, #tpu.memory_space<vmem>>, vector<32x32xf32>
    %cst_22 = arith.constant dense<0.000000e+00> : vector<8x32xf32>
    %34 = tpu.matmul %12, %33, %cst_22 {dimension_numbers = #tpu.dot_dimension_numbers<[1], [0], [0], [1], [0, 0, 1, 1], [], []>} : vector<8x32xf32>, vector<32x32xf32>, vector<8x32xf32> -> vector<8x32xf32>
    %c32_23 = arith.constant 32 : index
    %c0_24 = arith.constant 0 : index
    %35 = vector.load %arg6[%c32_23, %c0_24] : memref<64x32xf32, #tpu.memory_space<vmem>>, vector<32x32xf32>
    %cst_25 = arith.constant dense<0.000000e+00> : vector<8x32xf32>
    %36 = tpu.matmul %31, %35, %cst_25 {dimension_numbers = #tpu.dot_dimension_numbers<[1], [0], [0], [1], [0, 0, 1, 1], [], []>} : vector<8x32xf32>, vector<32x32xf32>, vector<8x32xf32> -> vector<8x32xf32>
    %37 = arith.addf %34, %36 : vector<8x32xf32>
    %38 = vector.broadcast %32 : vector<1x32xf32> to vector<8x32xf32>
    %39 = arith.addf %37, %38 : vector<8x32xf32>
    %cst_26 = arith.constant 0.000000e+00 : f32
    %40 = vector.broadcast %cst_26 : f32 to vector<8x32xf32>
    %41 = arith.maximumf %39, %40 : vector<8x32xf32>
    %c0_27 = arith.constant 0 : index
    %c0_28 = arith.constant 0 : index
    %c0_29 = arith.constant 0 : index
    %42 = vector.load %arg7[%c0_27, %c0_28, %c0_29] : memref<6x32x32xf32, #tpu.memory_space<vmem>>, vector<1x32x32xf32>
    %43 = vector.shape_cast %42 : vector<1x32x32xf32> to vector<32x32xf32>
    %cst_30 = arith.constant dense<0.000000e+00> : vector<8x32xf32>
    %44 = tpu.matmul %41, %43, %cst_30 {dimension_numbers = #tpu.dot_dimension_numbers<[1], [0], [0], [1], [0, 0, 1, 1], [], []>} : vector<8x32xf32>, vector<32x32xf32>, vector<8x32xf32> -> vector<8x32xf32>
    %c2 = arith.constant 2 : index
    %c0_31 = arith.constant 0 : index
    %45 = vector.load %arg8[%c2, %c0_31] : memref<16x128xf32, #tpu.memory_space<vmem>>, vector<1x32xf32>
    %46 = vector.broadcast %45 : vector<1x32xf32> to vector<8x32xf32>
    %47 = arith.addf %44, %46 : vector<8x32xf32>
    %c1_32 = arith.constant 1 : index
    %c0_33 = arith.constant 0 : index
    %c0_34 = arith.constant 0 : index
    %48 = vector.load %arg7[%c1_32, %c0_33, %c0_34] : memref<6x32x32xf32, #tpu.memory_space<vmem>>, vector<1x32x32xf32>
    %49 = vector.shape_cast %48 : vector<1x32x32xf32> to vector<32x32xf32>
    %cst_35 = arith.constant dense<0.000000e+00> : vector<8x32xf32>
    %50 = tpu.matmul %41, %49, %cst_35 {dimension_numbers = #tpu.dot_dimension_numbers<[1], [0], [0], [1], [0, 0, 1, 1], [], []>} : vector<8x32xf32>, vector<32x32xf32>, vector<8x32xf32> -> vector<8x32xf32>
    %c3 = arith.constant 3 : index
    %c0_36 = arith.constant 0 : index
    %51 = vector.load %arg8[%c3, %c0_36] : memref<16x128xf32, #tpu.memory_space<vmem>>, vector<1x32xf32>
    %52 = vector.broadcast %51 : vector<1x32xf32> to vector<8x32xf32>
    %53 = arith.addf %50, %52 : vector<8x32xf32>
    %c2_37 = arith.constant 2 : index
    %c0_38 = arith.constant 0 : index
    %c0_39 = arith.constant 0 : index
    %54 = vector.load %arg7[%c2_37, %c0_38, %c0_39] : memref<6x32x32xf32, #tpu.memory_space<vmem>>, vector<1x32x32xf32>
    %55 = vector.shape_cast %54 : vector<1x32x32xf32> to vector<32x32xf32>
    %cst_40 = arith.constant dense<0.000000e+00> : vector<8x32xf32>
    %56 = tpu.matmul %41, %55, %cst_40 {dimension_numbers = #tpu.dot_dimension_numbers<[1], [0], [0], [1], [0, 0, 1, 1], [], []>} : vector<8x32xf32>, vector<32x32xf32>, vector<8x32xf32> -> vector<8x32xf32>
    %c4 = arith.constant 4 : index
    %c0_41 = arith.constant 0 : index
    %57 = vector.load %arg8[%c4, %c0_41] : memref<16x128xf32, #tpu.memory_space<vmem>>, vector<1x32xf32>
    %58 = vector.broadcast %57 : vector<1x32xf32> to vector<8x32xf32>
    %59 = arith.addf %56, %58 : vector<8x32xf32>
    %c3_42 = arith.constant 3 : index
    %c0_43 = arith.constant 0 : index
    %c0_44 = arith.constant 0 : index
    %60 = vector.load %arg7[%c3_42, %c0_43, %c0_44] : memref<6x32x32xf32, #tpu.memory_space<vmem>>, vector<1x32x32xf32>
    %61 = vector.shape_cast %60 : vector<1x32x32xf32> to vector<32x32xf32>
    %cst_45 = arith.constant dense<0.000000e+00> : vector<8x32xf32>
    %62 = tpu.matmul %3, %61, %cst_45 {dimension_numbers = #tpu.dot_dimension_numbers<[1], [0], [0], [1], [0, 0, 1, 1], [], []>} : vector<8x32xf32>, vector<32x32xf32>, vector<8x32xf32> -> vector<8x32xf32>
    %c5 = arith.constant 5 : index
    %c0_46 = arith.constant 0 : index
    %63 = vector.load %arg8[%c5, %c0_46] : memref<16x128xf32, #tpu.memory_space<vmem>>, vector<1x32xf32>
    %64 = vector.broadcast %63 : vector<1x32xf32> to vector<8x32xf32>
    %65 = arith.addf %62, %64 : vector<8x32xf32>
    %c4_47 = arith.constant 4 : index
    %c0_48 = arith.constant 0 : index
    %c0_49 = arith.constant 0 : index
    %66 = vector.load %arg7[%c4_47, %c0_48, %c0_49] : memref<6x32x32xf32, #tpu.memory_space<vmem>>, vector<1x32x32xf32>
    %67 = vector.shape_cast %66 : vector<1x32x32xf32> to vector<32x32xf32>
    %cst_50 = arith.constant dense<0.000000e+00> : vector<8x32xf32>
    %68 = tpu.matmul %3, %67, %cst_50 {dimension_numbers = #tpu.dot_dimension_numbers<[1], [0], [0], [1], [0, 0, 1, 1], [], []>} : vector<8x32xf32>, vector<32x32xf32>, vector<8x32xf32> -> vector<8x32xf32>
    %c6 = arith.constant 6 : index
    %c0_51 = arith.constant 0 : index
    %69 = vector.load %arg8[%c6, %c0_51] : memref<16x128xf32, #tpu.memory_space<vmem>>, vector<1x32xf32>
    %70 = vector.broadcast %69 : vector<1x32xf32> to vector<8x32xf32>
    %71 = arith.addf %68, %70 : vector<8x32xf32>
    %c5_52 = arith.constant 5 : index
    %c0_53 = arith.constant 0 : index
    %c0_54 = arith.constant 0 : index
    %72 = vector.load %arg7[%c5_52, %c0_53, %c0_54] : memref<6x32x32xf32, #tpu.memory_space<vmem>>, vector<1x32x32xf32>
    %73 = vector.shape_cast %72 : vector<1x32x32xf32> to vector<32x32xf32>
    %cst_55 = arith.constant dense<0.000000e+00> : vector<8x32xf32>
    %74 = tpu.matmul %3, %73, %cst_55 {dimension_numbers = #tpu.dot_dimension_numbers<[1], [0], [0], [1], [0, 0, 1, 1], [], []>} : vector<8x32xf32>, vector<32x32xf32>, vector<8x32xf32> -> vector<8x32xf32>
    %c7 = arith.constant 7 : index
    %c0_56 = arith.constant 0 : index
    %75 = vector.load %arg8[%c7, %c0_56] : memref<16x128xf32, #tpu.memory_space<vmem>>, vector<1x32xf32>
    %76 = vector.broadcast %75 : vector<1x32xf32> to vector<8x32xf32>
    %77 = arith.addf %74, %76 : vector<8x32xf32>
    %78 = arith.addf %47, %65 : vector<8x32xf32>
    %79 = arith.negf %78 : vector<8x32xf32>
    %80 = math.exp %79 : vector<8x32xf32>
    %cst_57 = arith.constant 1.000000e+00 : f32
    %81 = vector.broadcast %cst_57 : f32 to vector<8x32xf32>
    %82 = arith.addf %81, %80 : vector<8x32xf32>
    %83 = arith.divf %81, %82 : vector<8x32xf32>
    %84 = arith.addf %53, %71 : vector<8x32xf32>
    %85 = arith.negf %84 : vector<8x32xf32>
    %86 = math.exp %85 : vector<8x32xf32>
    %cst_58 = arith.constant 1.000000e+00 : f32
    %87 = vector.broadcast %cst_58 : f32 to vector<8x32xf32>
    %88 = arith.addf %87, %86 : vector<8x32xf32>
    %89 = arith.divf %87, %88 : vector<8x32xf32>
    %90 = arith.mulf %83, %77 : vector<8x32xf32>
    %91 = arith.addf %59, %90 : vector<8x32xf32>
    %92 = math.tanh %91 : vector<8x32xf32>
    %cst_59 = arith.constant 1.000000e+00 : f32
    %93 = vector.broadcast %cst_59 : f32 to vector<8x32xf32>
    %94 = arith.subf %93, %89 : vector<8x32xf32>
    %95 = arith.mulf %94, %92 : vector<8x32xf32>
    %96 = arith.mulf %89, %3 : vector<8x32xf32>
    %97 = arith.addf %95, %96 : vector<8x32xf32>
    %c0_60 = arith.constant 0 : index
    %c0_61 = arith.constant 0 : index
    %98 = vector.load %arg11[%c0_60, %c0_61] : memref<8x32xf32, #tpu.memory_space<vmem>>, vector<8x32xf32>
    tpu.vector_store %arg11[%c0_60, %c0_61], %97 {strides = array<i32>} : memref<8x32xf32, #tpu.memory_space<vmem>>, vector<8x32xf32>,
    %c8 = arith.constant 8 : index
    %c0_62 = arith.constant 0 : index
    %99 = vector.load %arg8[%c8, %c0_62] : memref<16x128xf32, #tpu.memory_space<vmem>>, vector<1x64xf32>
    %c0_63 = arith.constant 0 : index
    %c0_64 = arith.constant 0 : index
    %100 = vector.load %arg9[%c0_63, %c0_64] : memref<32x64xf32, #tpu.memory_space<vmem>>, vector<32x64xf32>
    %cst_65 = arith.constant dense<0.000000e+00> : vector<8x64xf32>
    %101 = tpu.matmul %97, %100, %cst_65 {dimension_numbers = #tpu.dot_dimension_numbers<[1], [0], [0], [1], [0, 0, 1, 1], [], []>} : vector<8x32xf32>, vector<32x64xf32>, vector<8x64xf32> -> vector<8x64xf32>
    %102 = vector.broadcast %99 : vector<1x64xf32> to vector<8x64xf32>
    %103 = arith.addf %101, %102 : vector<8x64xf32>
    %cst_66 = arith.constant dense<0xFF800000> : vector<8xf32>
    %104 = vector.multi_reduction <maximumf>, %103, %cst_66 [1] : vector<8x64xf32> to vector<8xf32>
    %105 = vector.shape_cast %104 : vector<8xf32> to vector<8x1xf32>
    %106 = vector.broadcast %105 : vector<8x1xf32> to vector<8x64xf32>
    %107 = arith.subf %103, %106 : vector<8x64xf32>
    %108 = math.exp %107 : vector<8x64xf32>
    %cst_67 = arith.constant dense<0.000000e+00> : vector<8xf32>
    %109 = vector.multi_reduction <add>, %108, %cst_67 [1] : vector<8x64xf32> to vector<8xf32>
    %110 = vector.shape_cast %109 : vector<8xf32> to vector<8x1xf32>
    %111 = math.log %110 : vector<8x1xf32>
    %112 = vector.broadcast %111 : vector<8x1xf32> to vector<8x64xf32>
    %113 = arith.subf %107, %112 : vector<8x64xf32>
    %c0_68 = arith.constant 0 : index
    %c0_69 = arith.constant 0 : index
    %c0_70 = arith.constant 0 : index
    %114 = vector.load %arg10[%c0_68, %c0_69, %c0_70] : memref<1x8x128xf32, #tpu.memory_space<vmem>>, vector<1x8x64xf32>
    %115 = vector.shape_cast %114 : vector<1x8x64xf32> to vector<8x64xf32>
    %116 = vector.shape_cast %113 : vector<8x64xf32> to vector<1x8x64xf32>
    tpu.vector_store %arg10[%c0_68, %c0_69, %c0_70], %116 {strides = array<i32>} : memref<1x8x128xf32, #tpu.memory_space<vmem>>, vector<1x8x64xf32>,
    %c0_71 = arith.constant 0 : index
    %c0_72 = arith.constant 0 : index
    %c64 = arith.constant 64 : index
    %117 = vector.load %arg10[%c0_71, %c0_72, %c64] : memref<1x8x128xf32, #tpu.memory_space<vmem>>, vector<1x8x32xf32>
    %118 = vector.shape_cast %117 : vector<1x8x32xf32> to vector<8x32xf32>
    %119 = vector.shape_cast %97 : vector<8x32xf32> to vector<1x8x32xf32>
    tpu.vector_store %arg10[%c0_71, %c0_72, %c64], %119 {strides = array<i32>} : memref<1x8x128xf32, #tpu.memory_space<vmem>>, vector<1x8x32xf32>,
    %c0_73 = arith.constant 0 : index
    %c0_74 = arith.constant 0 : index
    %c96 = arith.constant 96 : index
    %120 = vector.load %arg10[%c0_73, %c0_74, %c96] : memref<1x8x128xf32, #tpu.memory_space<vmem>>, vector<1x8x8xf32>
    %121 = vector.shape_cast %120 : vector<1x8x8xf32> to vector<8x8xf32>
    %122 = vector.shape_cast %29 : vector<8x8xf32> to vector<1x8x8xf32>
    tpu.vector_store %arg10[%c0_73, %c0_74, %c96], %122 {strides = array<i32>} : memref<1x8x128xf32, #tpu.memory_space<vmem>>, vector<1x8x8xf32>,
    %cst_75 = arith.constant 0.000000e+00 : f32
    %123 = vector.broadcast %cst_75 : f32 to vector<8x24xf32>
    %c0_76 = arith.constant 0 : index
    %c0_77 = arith.constant 0 : index
    %c104 = arith.constant 104 : index
    %124 = vector.load %arg10[%c0_76, %c0_77, %c104] : memref<1x8x128xf32, #tpu.memory_space<vmem>>, vector<1x8x24xf32>
    %125 = vector.shape_cast %124 : vector<1x8x24xf32> to vector<8x24xf32>
    %126 = vector.shape_cast %123 : vector<8x24xf32> to vector<1x8x24xf32>
    tpu.vector_store %arg10[%c0_76, %c0_77, %c104], %126 {strides = array<i32>} : memref<1x8x128xf32, #tpu.memory_space<vmem>>, vector<1x8x24xf32>,
    return
  }
  func.func @transform_0(%arg0: i32) -> (i32, i32, i32) {
    %c0_i32 = arith.constant 0 : i32
    %c0_i32_0 = arith.constant 0 : i32
    %c0_i32_1 = arith.constant 0 : i32
    return %arg0, %c0_i32, %c0_i32_0 : i32, i32, i32
  }
  func.func @transform_1(%arg0: i32) -> (i32, i32) {
    %c0_i32 = arith.constant 0 : i32
    %c0_i32_0 = arith.constant 0 : i32
    %c0_i32_1 = arith.constant 0 : i32
    return %c0_i32, %c0_i32_0 : i32, i32
  }
  func.func @transform_2(%arg0: i32) -> (i32, i32) {
    %c0_i32 = arith.constant 0 : i32
    %c0_i32_0 = arith.constant 0 : i32
    %c0_i32_1 = arith.constant 0 : i32
    return %c0_i32, %c0_i32_0 : i32, i32
  }
  func.func @transform_3(%arg0: i32) -> (i32, i32) {
    %c0_i32 = arith.constant 0 : i32
    %c0_i32_0 = arith.constant 0 : i32
    %c0_i32_1 = arith.constant 0 : i32
    return %c0_i32, %c0_i32_0 : i32, i32
  }
  func.func @transform_4(%arg0: i32) -> (i32, i32) {
    %c0_i32 = arith.constant 0 : i32
    %c0_i32_0 = arith.constant 0 : i32
    %c0_i32_1 = arith.constant 0 : i32
    return %c0_i32, %c0_i32_0 : i32, i32
  }
  func.func @transform_5(%arg0: i32) -> (i32, i32) {
    %c0_i32 = arith.constant 0 : i32
    %c0_i32_0 = arith.constant 0 : i32
    %c0_i32_1 = arith.constant 0 : i32
    return %c0_i32, %c0_i32_0 : i32, i32
  }
  func.func @transform_6(%arg0: i32) -> (i32, i32, i32) {
    %c0_i32 = arith.constant 0 : i32
    %c0_i32_0 = arith.constant 0 : i32
    %c0_i32_1 = arith.constant 0 : i32
    %c0_i32_2 = arith.constant 0 : i32
    return %c0_i32, %c0_i32_0, %c0_i32_1 : i32, i32, i32
  }
  func.func @transform_7(%arg0: i32) -> (i32, i32) {
    %c0_i32 = arith.constant 0 : i32
    %c0_i32_0 = arith.constant 0 : i32
    %c0_i32_1 = arith.constant 0 : i32
    return %c0_i32, %c0_i32_0 : i32, i32
  }
  func.func @transform_8(%arg0: i32) -> (i32, i32) {
    %c0_i32 = arith.constant 0 : i32
    %c0_i32_0 = arith.constant 0 : i32
    %c0_i32_1 = arith.constant 0 : i32
    return %c0_i32, %c0_i32_0 : i32, i32
  }
  func.func @transform_9(%arg0: i32) -> (i32, i32, i32) {
    %c0_i32 = arith.constant 0 : i32
    %c0_i32_0 = arith.constant 0 : i32
    %c0_i32_1 = arith.constant 0 : i32
    return %arg0, %c0_i32, %c0_i32_0 : i32, i32, i32
  }
}

</mosaic_0001>

<bundles_post_ra>
// kernel: tpu_custom_call.1
= control target key start
LH: loop header
LB: loop body
LE: loop exit
PB: predicated region body
PF: predicated region fallthrough
CT: control target
= control target key end

     0   :  { %14 = vsyncpa [#allocation4], 0  ;;  %s1435_s0 = inlined_call_operand.vmem [shape: s32[6,8,1], index: 0, kind: input, shape index: {}]   ;;  %s1436_s1 = inlined_call_operand.vmem [shape: f32[8,32], index: 1, kind: input, shape index: {}]   ;;  %s1437_s2 = inlined_call_operand.vmem [shape: f32[8,32], index: 2, kind: input, shape index: {}]   ;;  %s1438_s3 = inlined_call_operand.vmem [shape: f32[64,32], index: 3, kind: input, shape index: {}]   ;;  %s1439_s4 = inlined_call_operand.vmem [shape: f32[64,8], index: 4, kind: input, shape index: {}]   ;;  %s1440_s5 = inlined_call_operand.vmem [shape: f32[64,32], index: 5, kind: input, shape index: {}]   ;;  %s1441_s6 = inlined_call_operand.hbm [shape: f32[6,32,32], index: 6, kind: input, shape index: {}]   ;;  %s1442_s7 = inlined_call_operand.vmem [shape: f32[16,128], index: 7, kind: input, shape index: {}]   ;;  %s1443_s8 = inlined_call_operand.vmem [shape: f32[32,64], index: 8, kind: input, shape index: {}]   ;;  %s1444_s9 = inlined_call_operand.hbm [shape: f32[6,8,128], index: 9, kind: output, shape index: {}]  }
   0x1   :  { %15 = vsyncpa [#allocation5], 0 }
   0x2   :  { %17 = vsyncpa [#allocation5 + $0x1], 0  ;;  %s1177_s30 = smov 0   ;;  %s1179_s10 = smov 0  }
   0x3   :  { %s1181_s11 = smov 0   ;;  %s1183_s12 = smov 0  }
   0x4 LB: > { %s1198_s13 = sadd.s32 4294967295, %s1118_s12   ;;  %s909_s14 = sadd.s32 4294967294, %s1118_s12   ;;  %s1118_s12 = sphi %s1183_s12, %s1450_s12   ;;  %s1114_s11 = sphi %s1181_s11, %s1449_s11   ;;  %s1110_s10 = sphi %s1179_s10, %s1448_s10   ;;  %s1106_s30 = sphi %s1177_s30, %s1447_s30  }
   0x5   : > { %s1202_s15 = sadd.s32 1, %s1118_s12   ;;  %s224_s16 = sadd.s32 1, %s1114_s11 }
   0x6   : > { %s221_s17 = ssub.s32 %s1118_s12, %s1202_s15  ;;  %p234_p0 = scmp.ne.s32.totalorder %s1114_s11, %s1110_s10 }
   0x7   : > { %p222_p1 = scmp.eq.s32.totalorder %s221_s17, 0  ;;  %p235_p2 = scmp.eq.s32.totalorder %s1198_s13, 5 }
   0x8   : > { %p240_p3 = scmp.ne.s32.totalorder %s1110_s10, %s1106_s30  ;;  %p241_p4 = scmp.eq.s32.totalorder %s909_s14, 5 }
   0x9   : > { %s1213_s18 = scalar_select %p222_p1, %s1114_s11, %s224_s16  }
   0xa   : > { %p1215_p5 = por %p235_p2, %p234_p0  ;;  %p1219_p6 = por %p241_p4, %p240_p3 }
   0xb   : > { %p910_p7 = scmp.ge.s32.totalorder %s1118_s12, 1  ;;  %p248_p8 = scmp.lt.s32.totalorder %s1118_s12, 7 }
   0xc   : > { %p911_p9 = scmp.ne.s32.totalorder %s1198_s13, 0  ;;  %p952_p10 = scmp.eq.s32.totalorder %s1198_s13, 0 }
   0xd   : > { %p249_p11 = pnand %p910_p7, %p248_p8  ;;  %s274_s23 = sshll.u32 %s1441_s6, 4  ;;  %s275_s23 = int_to_ptr.hbm [resolvable:$true] %s274_s23 }
   0xe   : > { %s1120_s24 = smov [#allocation3]   ;;  %s1121_s26 = smov 128  }
   0xf   : > { %p944_p12 = pneg %p249_p11  ;;  %s276_s25 = sshll.u32 %s1120_s24, 4  ;;  %s277_s25 = int_to_ptr.vmem [resolvable:$true] %s276_s25 }
  0x10   : > { %s1122_s27 = smov 8   ;;  %305 = sbr.rel (%p249_p11) target bundleno = 1514 (0x5ea), region = 56 }
  0x11   : > { %p945_p13 = pnand %p952_p10, %p944_p12 }
  0x13   : > { %947 = dma.hbm_to_vmem [thread:$0]  (!%p945_p13), %s275_s23, 3072, %s277_s25, [#allocation4], %s1121_s26, %s1121_s26, %s1122_s27  }
  0x15   : > { %1097 = dma.done.wait (%p952_p10), [#allocation4], 3072  }
  0x16   : > { %1099 = vsyncadd (%p952_p10), [#allocation4], 4294964224  ;;  %s338_s28 = sand.u32 1, %s1110_s10   ;;  %p341_p0 = scmp.lt.s32.totalorder %s1198_s13, 5 }
  0x17   : > { %s915_s29 = sshll.u32 %s338_s28, 3  ;;  %348 = sbr.rel (%p911_p9) target bundleno = 30 (0x1e), region = 64 }
  0x18   : > { %s342_s14 = scalar_select %p341_p0, %s1198_s13, 5 }
  0x19   : > { %s1244_s23 = scalar_lea.vmem [#allocation6], %s915_s29 }
  0x1a   : > { %s916_s16 = sshll.u32 %s342_s14, 3 }
  0x1b   : > { %s344_s22 = scalar_lea.vmem %s1435_s0, %s916_s16 }
  0x1c   : > { %v349_v0 = vld [vmem:[%s1436_s1] sm:$0xff]  ;;  %vm350_vm0 = vcmask 261120  }
  0x1d   : > { %351 = vst.msk [vmem:[#allocation2] sm:$0xff] %vm350_vm0, %v349_v0 }
  0x1e PF: > { %v353_v1 = vld [vmem:[%s344_s22] sm:$0xff]  ;;  %v369_v2 = vld [vmem:[%s1438_s3 + $0x38] sm:$0xff]  ;;  %v368_v3 = vld [vmem:[%s1438_s3 + $0x30] sm:$0xff]  ;;  %v1123_v4 = vmov 0   ;;  %vm403_vm1 = vcmask 261120   ;;  %v354_v22 = vlaneseq  ;;  %vm370_vm2 = vcmask 523264  }
  0x1f   : > { %994 = vset.pattern.permute.xlu0 %v1123_v4  ;;  %382 = vmatpush.msra.mxu0 %v369_v2  ;;  %v367_v5 = vld [vmem:[%s1438_s3 + $0x28] sm:$0xff]  ;;  %v366_v6 = vld [vmem:[%s1438_s3 + $0x20] sm:$0xff]  ;;  %v365_v7 = vld [vmem:[%s1438_s3 + $0x18] sm:$0xff]  ;;  %v1124_v25 = vmov 0.0   ;;  %vm452_vm4 = vcmask 64512   ;;  %s1125_s21 = smov 96  }
  0x20   : > { %357 = vperm.xlu0 %994, %v353_v1   ;;  %v364_v8 = vld [vmem:[%s1438_s3 + $0x10] sm:$0xff]  ;;  %v363_v9 = vld [vmem:[%s1438_s3 + $0x8] sm:$0xff]  ;;  %v362_v10 = vld [vmem:[%s1438_s3] sm:$0xff]  ;;  %v355_v23 = vand.u32 127, %v354_v22  ;;  %s1126_s24 = smov 64   ;;  %s935_s22 = sshll.u32 %s1198_s13, 3 }
  0x21   : > { %383 = vmatpush.msra.mxu0 %v368_v3  ;;  %v402_v11 = vld [vmem:[%s1439_s4 + $0x38] sm:$0xff]  ;;  %v401_v12 = vld [vmem:[%s1439_s4 + $0x30] sm:$0xff]  ;;  %v400_v14 = vld [vmem:[%s1439_s4 + $0x28] sm:$0xff]  ;;  %s833_s27 = scalar_lea.hbm %s1444_s9, %s935_s22  ;;  %s835_s14 = sshll.u32 %s1244_s23, 4  ;;  %s836_s14 = int_to_ptr.vmem [resolvable:$true] %s835_s14 }
  0x22   : > { %419 = vmatpush.msra.mxu1 %v402_v11  ;;  %v398_v13 = vld [vmem:[%s1439_s4 + $0x18] sm:$0xff]  ;;  %v397_v15 = vld [vmem:[%s1439_s4 + $0x10] sm:$0xff]  ;;  %v396_v16 = vld [vmem:[%s1439_s4 + $0x8] sm:$0xff]  ;;  %s837_s17 = sshll.u32 %s833_s27, 4  ;;  %s823_s13 = scalar_lea.sflag [#allocation5], %s338_s28  ;;  %s838_s17 = int_to_ptr.hbm [resolvable:$true] %s837_s17 }
  0x23   : > { %384 = vmatpush.msra.mxu0 %v367_v5  ;;  %442 = vmatpush.msra.mxu2 %v398_v13  ;;  %v399_v17 = vld [vmem:[%s1439_s4 + $0x20] sm:$0xff]  ;;  %v505_v19 = vld [vmem:[%s1440_s5 + $0x18] sm:$0xff]  ;;  %v504_v20 = vld [vmem:[%s1440_s5 + $0x10] sm:$0xff]  ;;  %s1066_s29 = sshra.s32 %s838_s17, 4  ;;  %s1072_s22 = scalar_lea.hbm %s1444_s9, 48  ;;  %s1067_s29 = int_to_ptr.hbm [resolvable:$true] %s1066_s29 }
  0x24   : > { %420 = vmatpush.msra.mxu1 %v401_v12  ;;  %v1296_v18 = vld [vmem:[#allocation2] sm:$0xff]  ;;  %v503_v21 = vld [vmem:[%s1440_s5 + $0x8] sm:$0xff]  ;;  %v509_v42 = vld [vmem:[%s1440_s5 + $0x38] sm:$0xff]  ;;  %s1068_s16 = scalar_lea.hbm %s1067_s29, 8  ;;  %p1073_p4 = scmp.lt.s32.totalorder %s1067_s29, %s1444_s9 }
  0x25   : > { %385 = vmatpush.msra.mxu0 %v366_v6  ;;  %443 = vmatpush.msra.mxu2 %v397_v15  ;;  %v395_v27 = vld [vmem:[%s1439_s4] sm:$0xff]  ;;  %v508_v43 = vld [vmem:[%s1440_s5 + $0x30] sm:$0xff]  ;;  %v507_v44 = vld [vmem:[%s1440_s5 + $0x28] sm:$0xff]  ;;  %p1069_p1 = scmp.ne.s32.totalorder %s1067_s29, %s1068_s16  ;;  %p1074_p7 = scmp.lt.s32.totalorder %s1072_s22, %s1068_s16 }
  0x26   : > { %421 = vmatpush.msra.mxu1 %v400_v14  ;;  %v502_v28 = vld [vmem:[%s1440_s5] sm:$0xff]  ;;  %v558_v62 = vld [vmem:[#allocation3 + $0x10] sm:$0xff]  ;;  %v557_v1 = vld [vmem:[#allocation3 + $0x8] sm:$0xff] }
  0x27   : > { %386 = vmatpush.msra.mxu0 %v365_v7  ;;  %444 = vmatpush.msra.mxu2 %v396_v16  ;;  %v995_v30 = vld [vmem:[%s1442_s7] ss:$0 sm:$0xff]  ;;  %v588_v63 = vld [vmem:[#allocation3 + $0x30] sm:$0xff]  ;;  %v587_v2 = vld [vmem:[#allocation3 + $0x28] sm:$0xff]  ;;  %p1070_p2 = pnand %p1069_p1, %p1215_p5  ;;  %p1075_p8 = por %p1074_p7, %p1073_p4 }
  0x28   : > { %422 = vmatpush.msra.mxu1 %v399_v17  ;;  %v477_v41 = vld [vmem:[%s1437_s2] sm:$0xff]  ;;  %v615_v0 = vld [vmem:[#allocation3 + $0x50] sm:$0xff]  ;;  %v614_v3 = vld [vmem:[#allocation3 + $0x48] sm:$0xff] }
  0x29   : > { %387 = vmatpush.msra.mxu0 %v364_v8  ;;  %920 = vmatmul.msk.f32.vlgmr.msra.gmra.mxu1 %vm403_vm1, %v1296_v18  ;;  %v506_v45 = vld [vmem:[%s1440_s5 + $0x20] sm:$0xff]  ;;  %v556_v4 = vld [vmem:[#allocation3] sm:$0xff]  ;;  %v642_v8 = vld [vmem:[#allocation3 + $0x70] sm:$0xff]  ;;  %p1071_p3 = pneg %p1070_p2 }
  0x2a   : > { %545 = vmatpush.msrb.mxu1 %v505_v19  ;;  %445 = vmatpush.msra.mxu2 %v395_v27  ;;  %v559_v58 = vld [vmem:[#allocation3 + $0x18] sm:$0xff]  ;;  %v586_v6 = vld [vmem:[#allocation3 + $0x20] sm:$0xff]  ;;  %v669_v11 = vld [vmem:[#allocation3 + $0x90] sm:$0xff] }
  0x2b   : > { %388 = vmatpush.msra.mxu0 %v363_v9  ;;  %496 = vmatpush.msra.mxu3 %v477_v41  ;;  %v589_v60 = vld [vmem:[#allocation3 + $0x38] sm:$0xff]  ;;  %v613_v7 = vld [vmem:[#allocation3 + $0x40] sm:$0xff]  ;;  %v668_v13 = vld [vmem:[#allocation3 + $0x88] sm:$0xff]  ;;  %p1076_p9 = pnand %p1075_p8, %p1071_p3 }
  0x2c   : > { %546 = vmatpush.msrb.mxu1 %v504_v20  ;;  %577 = vmatpush.msrb.mxu2 %v559_v58  ;;  %v616_v61 = vld [vmem:[#allocation3 + $0x58] sm:$0xff]  ;;  %v640_v12 = vld [vmem:[#allocation3 + $0x60] sm:$0xff]  ;;  %v696_v16 = vld [vmem:[#allocation3 + $0xb0] sm:$0xff] }
  0x2d   : > { %389 = vmatpush.msra.mxu0 %v362_v10  ;;  %525 = vmatpush.msrb.mxu3 %v509_v42  ;;  %v643_v5 = vld [vmem:[#allocation3 + $0x78] sm:$0xff]  ;;  %v641_v10 = vld [vmem:[#allocation3 + $0x68] sm:$0xff]  ;;  %v667_v14 = vld [vmem:[#allocation3 + $0x80] sm:$0xff] }
  0x2e   : > { %547 = vmatpush.msrb.mxu1 %v503_v21  ;;  %578 = vmatpush.msrb.mxu2 %v558_v62  ;;  %v670_v9 = vld [vmem:[#allocation3 + $0x98] sm:$0xff]  ;;  %v695_v17 = vld [vmem:[#allocation3 + $0xa8] sm:$0xff]  ;;  %v694_v19 = vld [vmem:[#allocation3 + $0xa0] sm:$0xff] }
  0x2f   : > { %526 = vmatpush.msrb.mxu3 %v508_v43  ;;  %631 = vmatpush.msrb.mxu0 %v616_v61  ;;  %v697_v15 = vld [vmem:[#allocation3 + $0xb8] sm:$0xff]  ;;  %v772_v41 = vld [vmem:[%s1443_s8 + $0x18] sm:$0xff]  ;;  %v771_v43 = vld [vmem:[%s1443_s8 + $0x10] sm:$0xff] }
  0x30   : > { %548 = vmatpush.msrb.mxu1 %v502_v28  ;;  %579 = vmatpush.msrb.mxu2 %v557_v1  ;;  %v996_v20 = vld [vmem:[%s1442_s7 + $0x1] ss:$0 sm:$0xff]  ;;  %v1000_v27 = vld [vmem:[%s1442_s7 + $0x5] ss:$0 sm:$0xff] }
  0x31   : > { %527 = vmatpush.msrb.mxu3 %v507_v44  ;;  %632 = vmatpush.msrb.mxu0 %v615_v0  ;;  %v770_v44 = vld [vmem:[%s1443_s8 + $0x8] sm:$0xff] }
  0x32   : > { %580 = vmatpush.msrb.mxu2 %v556_v4  ;;  %658 = vmatpush.msra.mxu1 %v643_v5 }
  0x33   : > { %528 = vmatpush.msrb.mxu3 %v506_v45  ;;  %633 = vmatpush.msrb.mxu0 %v614_v3 }
  0x34   : > { %659 = vmatpush.msra.mxu1 %v642_v8 }
  0x35   : > { %634 = vmatpush.msrb.mxu0 %v613_v7 }
  0x36   : > { %660 = vmatpush.msra.mxu1 %v641_v10 }
  0x38   : > { %661 = vmatpush.msra.mxu1 %v640_v12 }
  0x92   : > { %v358_v24 = vpop.permute.xlu0 %357 }
  0x93   : > { %vm359_vm3 = vcmp.eq.s32.totalorder %v358_v24, %v355_v23 }
  0x94   : > { %v918_v26 = vsel %vm359_vm3, 1.0, %v1124_v25  ;;  %vm818_vm3 = vcmask 851712  }
  0x95   : > { %919 = vmatmul.msk.f32.vlgmr.msra.gmra.mxu0 %vm370_vm2, %v918_v26 }
  0x96   : > { %789 = vmatpush.msra.mxu0 %v772_v41 }
  0x98   : > { %790 = vmatpush.msra.mxu0 %v771_v43 }
  0x9a   : > { %791 = vmatpush.msra.mxu0 %v770_v44 }
  0xa6   : > { %v424_v31 = vpop.f32.mrf.mxu1 }
 0x112   : > { %v391_v29 = vpop.f32.mrf.mxu0 }
 0x113   : > { %921 = vmatmul.msk.f32.vlgmr.msra.gmra.mxu2 %vm403_vm1, %v391_v29  ;;  %924 = vmatmul.msk.f32.vlgmr.msrb.gmra.mxu1 %vm403_vm1, %v391_v29  ;;  %v998_v29 = vld [vmem:[%s1442_s7 + $0x2] ss:$0 sm:$0xff] }
 0x114   : > { %685 = vmatpush.msra.mxu2 %v670_v9 }
 0x116   : > { %686 = vmatpush.msra.mxu2 %v669_v11 }
 0x118   : > { %687 = vmatpush.msra.mxu2 %v668_v13 }
 0x11a   : > { %688 = vmatpush.msra.mxu2 %v667_v14 }
 0x11b   : > { %928 = vmatmul.msk.f32.vlgmr.msra.gmra.mxu1 %vm403_vm1, %v1296_v18 }
 0x190   : > { %v550_v21 = vpop.f32.mrf.mxu1 }
 0x196   : > { %v447_v32 = vpop.f32.mrf.mxu2 }
 0x197   : > { %v448_v33 = vadd.f32 %v447_v32, %v424_v31 }
 0x198   : > { %v663_v28 = vpop.f32.mrf.mxu1 }
 0x199   : > { %v451_v34 = vadd.f32 %v995_v30, %v448_v33  ;;  %v664_v30 = vadd.f32 %v1000_v27, %v663_v28 }
 0x19b   : > { %v453_v35 = vsel %vm452_vm4, %v451_v34, -inf }
 0x19c   : > { %454 = vmax.xlane.f32.xlu0 %v453_v35 }
 0x20f   : > { %v455_v36 = vpop.xlane.xlu0 %454 }
 0x210   : > { %v456_v37 = vsub.f32 %v451_v34, %v455_v36  ;;  %v999_v34 = vld [vmem:[%s1442_s7 + $0x3] ss:$0 sm:$0xff]  ;;  %v1001_v36 = vld [vmem:[%s1442_s7 + $0x6] ss:$0 sm:$0xff] }
 0x212   : > { %v457_v38 = vmul.f32 1.442695, %v456_v37 }
 0x214   : > { %1004 = vpow2.f32 %v457_v38 }
 0x21a   : > { %v1005_v39 = vpop.eup %1004 }
 0x21b   : > { %v459_v40 = vsel %vm452_vm4, %v1005_v39, 0.0 }
 0x21c   : > { %460 = vadd.xlane.f32.xlu1 %v459_v40 }
 0x28f   : > { %v461_v46 = vpop.xlane.xlu1 %460 }
 0x290   : > { %1006 = vrcp.f32 %v461_v46  ;;  %v473_v50 = vand.u32 2147483648, %v461_v46  ;;  %v471_v52 = vand.u32 2147483647, %v461_v46  ;;  %vm467_vm6 = vweird.f32 %v461_v46 }
 0x292   : > { %v474_v54 = vor.u32 1.1754944e-38, %v473_v50  ;;  %vm472_vm8 = vcmp.eq.f32.partialorder %v471_v52, 8.507059e+37 }
 0x296   : > { %v1007_v47 = vpop.eup %1006 }
 0x297   : > { %v463_v48 = vmul.f32 %v1007_v47, %v461_v46  ;;  %vm468_vm5 = vweird.f32 %v1007_v47 }
 0x298   : > { %vm469_vm7 = vmor %vm467_vm6, %vm468_vm5 }
 0x299   : > { %v464_v49 = vsub.f32 1.0, %v463_v48 }
 0x29b   : > { %v465_v51 = vmul.f32 %v1007_v47, %v464_v49 }
 0x29d   : > { %v466_v53 = vadd.f32 %v1007_v47, %v465_v51 }
 0x29f   : > { %v470_v55 = vsel %vm469_vm7, %v1007_v47, %v466_v53  ;;  %v769_v47 = vld [vmem:[%s1443_s8] sm:$0xff] }
 0x2a0   : > { %v475_v56 = vsel %vm472_vm8, %v474_v54, %v470_v55  ;;  %792 = vmatpush.msra.mxu0 %v769_v47  ;;  %v1002_v53 = vld [vmem:[%s1442_s7 + $0x7] ss:$0 sm:$0xff] }
 0x2a1   : > { %v1339_v57 = vmul.f32 %v1005_v39, %v475_v56 }
 0x2a3   : > { %922 = vmatmul.msk.f32.vlgmr.msra.gmra.mxu3 %vm452_vm4, %v1339_v57  ;;  %vm820_vm4 = vcmask 1048384  }
 0x2a4   : > { %604 = vmatpush.msra.mxu3 %v589_v60  ;;  %v997_v60 = vld [vmem:[%s1442_s7 + $0x4] ss:$0 sm:$0xff] }
 0x2a6   : > { %605 = vmatpush.msra.mxu3 %v588_v63 }
 0x2a8   : > { %606 = vmatpush.msra.mxu3 %v587_v2 }
 0x2aa   : > { %607 = vmatpush.msra.mxu3 %v586_v6 }
 0x326   : > { %v498_v59 = vpop.f32.mrf.mxu3 }
 0x327   : > { %923 = vmatmul.msk.f32.vlgmr.msrb.gmra.mxu3 %vm403_vm1, %v498_v59 }
 0x328   : > { %712 = vmatpush.msrb.mxu3 %v697_v15 }
 0x32a   : > { %713 = vmatpush.msrb.mxu3 %v696_v16 }
 0x32c   : > { %714 = vmatpush.msrb.mxu3 %v695_v17 }
 0x32e   : > { %715 = vmatpush.msrb.mxu3 %v694_v19 }
 0x3aa   : > { %v530_v22 = vpop.f32.mrf.mxu3 }
 0x3ab   : > { %v551_v23 = vadd.f32 %v550_v21, %v530_v22  ;;  %v1003_v22 = vld [vmem:[%s1442_s7 + $0x8] ss:$0 sm:$0xff] }
 0x3ad   : > { %v554_v24 = vadd.f32 %v996_v20, %v551_v23 }
 0x3af   : > { %v555_v26 = vmax.f32 %v554_v24, 0.0 }
 0x3b1   : > { %925 = vmatmul.msk.f32.vlgmr.msrb.gmra.mxu2 %vm403_vm1, %v555_v26  ;;  %926 = vmatmul.msk.f32.vlgmr.msra.gmra.mxu3 %vm403_vm1, %v555_v26 }
 0x3b2   : > { %927 = vmatmul.msk.f32.vlgmr.msrb.gmra.mxu0 %vm403_vm1, %v555_v26 }
 0x3b9   : > { %929 = vmatmul.msk.f32.vlgmr.msra.gmra.mxu2 %vm403_vm1, %v1296_v18  ;;  %930 = vmatmul.msk.f32.vlgmr.msrb.gmra.mxu3 %vm403_vm1, %v1296_v18 }
 0x42f   : > { %v636_v0 = vpop.f32.mrf.mxu0 }
 0x430   : > { %v637_v5 = vadd.f32 %v997_v60, %v636_v0 }
 0x434   : > { %v582_v31 = vpop.f32.mrf.mxu2  ;;  %v609_v37 = vpop.f32.mrf.mxu3 }
 0x435   : > { %v583_v32 = vadd.f32 %v998_v29, %v582_v31  ;;  %v610_v39 = vadd.f32 %v999_v34, %v609_v37 }
 0x437   : > { %v720_v33 = vadd.f32 %v664_v30, %v583_v32 }
 0x439   : > { %v931_v35 = vmul.f32 -1.442695, %v720_v33 }
 0x43b   : > { %1008 = vpow2.f32 %v931_v35 }
 0x43c   : > { %v690_v38 = vpop.f32.mrf.mxu2  ;;  %v717_v55 = vpop.f32.mrf.mxu3 }
 0x43d   : > { %v691_v40 = vadd.f32 %v1001_v36, %v690_v38  ;;  %v718_v61 = vadd.f32 %v1002_v53, %v717_v55 }
 0x43f   : > { %v740_v42 = vadd.f32 %v691_v40, %v610_v39 }
 0x441   : > { %v1009_v45 = vpop.eup %1008  ;;  %v932_v46 = vmul.f32 -1.442695, %v740_v42 }
 0x442   : > { %v724_v48 = vadd.f32 1.0, %v1009_v45 }
 0x443   : > { %1010 = vpow2.f32 %v932_v46 }
 0x444   : > { %1012 = vrcp.f32 %v724_v48  ;;  %v736_v56 = vand.u32 2147483648, %v724_v48  ;;  %v734_v59 = vand.u32 2147483647, %v724_v48  ;;  %vm730_vm10 = vweird.f32 %v724_v48 }
 0x446   : > { %v737_v1 = vor.u32 1.1754944e-38, %v736_v56  ;;  %vm735_vm12 = vcmp.eq.f32.partialorder %v734_v59, 8.507059e+37 }
 0x449   : > { %v1011_v49 = vpop.eup %1010 }
 0x44a   : > { %v1013_v50 = vpop.eup %1012  ;;  %v744_v51 = vadd.f32 1.0, %v1011_v49 }
 0x44b   : > { %v726_v52 = vmul.f32 %v1013_v50, %v724_v48  ;;  %vm731_vm9 = vweird.f32 %v1013_v50 }
 0x44c   : > { %1014 = vrcp.f32 %v744_v51  ;;  %vm732_vm11 = vmor %vm730_vm10, %vm731_vm9  ;;  %v756_v8 = vand.u32 2147483648, %v744_v51  ;;  %v754_v10 = vand.u32 2147483647, %v744_v51  ;;  %vm750_vm14 = vweird.f32 %v744_v51 }
 0x44d   : > { %v727_v54 = vsub.f32 1.0, %v726_v52 }
 0x44e   : > { %v757_v13 = vor.u32 1.1754944e-38, %v756_v8  ;;  %vm755_vm0 = vcmp.eq.f32.partialorder %v754_v10, 8.507059e+37 }
 0x44f   : > { %v728_v58 = vmul.f32 %v1013_v50, %v727_v54 }
 0x451   : > { %v729_v62 = vadd.f32 %v1013_v50, %v728_v58 }
 0x452   : > { %v1015_v63 = vpop.eup %1014 }
 0x453   : > { %v746_v2 = vmul.f32 %v1015_v63, %v744_v51  ;;  %v733_v3 = vsel %vm732_vm11, %v1013_v50, %v729_v62  ;;  %vm751_vm13 = vweird.f32 %v1015_v63 }
 0x454   : > { %v738_v4 = vsel %vm735_vm12, %v737_v1, %v733_v3  ;;  %vm752_vm15 = vmor %vm750_vm14, %vm751_vm13 }
 0x455   : > { %v747_v6 = vsub.f32 1.0, %v746_v2  ;;  %v760_v7 = vmul.f32 %v738_v4, %v718_v61 }
 0x457   : > { %v748_v9 = vmul.f32 %v1015_v63, %v747_v6  ;;  %v761_v11 = vadd.f32 %v760_v7, %v637_v5 }
 0x459   : > { %v749_v12 = vadd.f32 %v1015_v63, %v748_v9  ;;  %1016 = vtanh.f32 %v761_v11 }
 0x45b   : > { %v753_v14 = vsel %vm752_vm15, %v1015_v63, %v749_v12 }
 0x45c   : > { %v758_v15 = vsel %vm755_vm0, %v757_v13, %v753_v14 }
 0x45d   : > { %v763_v16 = vsub.f32 1.0, %v758_v15  ;;  %v765_v20 = vmul.f32 %v758_v15, %v1296_v18 }
 0x45f   : > { %v1017_v17 = vpop.eup %1016 }
 0x460   : > { %v764_v19 = vmul.f32 %v1017_v17, %v763_v16 }
 0x462   : > { %v766_v21 = vadd.f32 %v765_v20, %v764_v19 }
 0x464   : > { %767 = vst.msk [vmem:[#allocation2] sm:$0xff] %vm403_vm1, %v766_v21  ;;  %933 = vmatmul.msk.f32.vlgmr.msra.gmra.mxu0 %vm403_vm1, %v766_v21  ;;  %vm813_vm1 = vcmask 785920  }
 0x4e1   : > { %v794_v23 = vpop.f32.mrf.mxu0 }
 0x4e2   : > { %v795_v24 = vadd.f32 %v1003_v22, %v794_v23 }
 0x4e4   : > { %v797_v26 = vsel %vm370_vm2, %v795_v24, -inf }
 0x4e5   : > { %798 = vmax.xlane.f32.xlu1 %v797_v26 }
 0x4fe   : > { %815 = vrot.lane.b32.xlu1 %v1339_v57, %s1125_s21 }
 0x558   : > { %v799_v27 = vpop.xlane.xlu1 %798 }
 0x559   : > { %v800_v18 = vsub.f32 %v795_v24, %v799_v27 }
 0x55b   : > { %v801_v28 = vmul.f32 1.442695, %v800_v18 }
 0x55d   : > { %1018 = vpow2.f32 %v801_v28 }
 0x563   : > { %v1019_v29 = vpop.eup %1018 }
 0x564   : > { %v803_v30 = vsel %vm370_vm2, %v1019_v29, 0.0 }
 0x565   : > { %804 = vadd.xlane.f32.xlu2 %v803_v30 }
 0x570   : > { %v816_v35 = vpop.permute.xlu1 %815 }
 0x57d   : > { %810 = vrot.lane.b32.xlu2 %v766_v21, %s1126_s24 }
 0x5d8   : > { %v805_v31 = vpop.xlane.xlu2 %804 }
 0x5d9   : > { %1020 = vlog2.f32 %v805_v31 }
 0x5df   : > { %v1021_v32 = vpop.eup %1020 }
 0x5e0   : > { %v807_v57 = vmul.f32 0.6931472, %v1021_v32  ;;  %v811_v34 = vpop.permute.xlu2 %810 }
 0x5e2   : > { %v808_v33 = vsub.f32 %v800_v18, %v807_v57 }
 0x5e4   : > { %809 = vst.msk [vmem:[%s1244_s23] sm:$0xff] %vm370_vm2, %v808_v33 }
 0x5e5   : > { %814 = vst.msk [vmem:[%s1244_s23] sm:$0xff] %vm813_vm1, %v811_v34 }
 0x5e6   : > { %819 = vst.msk [vmem:[%s1244_s23] sm:$0xff] %vm818_vm3, %v816_v35 }
 0x5e7   : > { %821 = vst.msk [vmem:[%s1244_s23] sm:$0xff] %vm820_vm4, %v1124_v25 }
 0x5e8   : > { %1079 = shalt.err (!%p1076_p9)
}
 0x5e9   : > { %942 = dma.vmem_to_hbm [thread:$0]  (%p1215_p5), %s836_s14, 128, %s838_s17, %s823_s13  }
 0x5ea PF: > { %p954_p10 = scmp.ge.s32.totalorder %s1118_s12, 2  ;;  %s849_s28 = sand.u32 1, %s1106_s30  }
 0x5eb   : > { %s850_s23 = scalar_lea.sflag [#allocation5], %s849_s28 }
 0x5ec   : > { %p949_p11 = pnand %p954_p10, %p1219_p6 }
 0x5ee   : > { %p950_p12 = pneg %p949_p11 }
 0x5f0   : > { %1101 = dma.done.wait (%p950_p12), %s850_s23, 128  }
 0x5f1   : > { %1103 = vsyncadd (%p950_p12), %s850_s23, 4294967168  ;;  %p20_p13 = scmp.ge.s32.totalorder %s1202_s15, 8   ;;  %s1447_s30 = smov %s1110_s10 }
 0x5f2   : > { %s1448_s10 = smov %s1114_s11  ;;  %s1449_s11 = smov %s1213_s18 }
 0x5f3   : > { %s1450_s12 = smov %s1202_s15  ;;  %22 = sbr.rel (!%p20_p13) target bundleno = 4 (0x4), region = 105 }
 0x5f8   :  { %856 = vsyncpa [#allocation4], 1 }
 0x5f9   :  { %858 = vsyncpa [#allocation4 + $0x1], 1 }
 0x5fa   :  { %859 = vsyncpa [#allocation5], 1 }
 0x5fb   :  { %861 = vsyncpa [#allocation5 + $0x1], 1 }

</bundles_post_ra>
